<compile_context>
chip_gen: v7x
topology: tpu7x:2x2x1
jax: 0.10.0
libtpu: 0.0.40
codegen_flags: <defaults>
</compile_context>

<pallas_src>
import math

import jax
import jax.numpy as jnp
from jax.experimental import pallas as pl
from jax.experimental.pallas import tpu as pltpu


def _round_up(a, b):
    return -(-a // b) * b


def _stem_kernel(w_ref, shift_ref, x_ref, o_ref):
    # w_ref     : (Cout, Kc)     bf16  conv weight with BN scale folded in
    # shift_ref : (Cout, 1)      f32   folded BN shift (beta - mean * scale)
    # x_ref     : (1, Kc, TM)    bf16  im2col patches, lanes = output pixels
    # o_ref     : (1, Cout, TM)  bf16
    acc = jnp.dot(w_ref[...], x_ref[0], preferred_element_type=jnp.float32)
    y = acc + shift_ref[...]                                 # BN (scale already in W)
    y = y * pl.reciprocal(1.0 + jnp.exp(-y), approx=True)    # swish = y * sigmoid(y)
    o_ref[0, :, :] = y.astype(o_ref.dtype)


def stem_forward(x_nchw, w_oihw, gamma, beta, run_mean, run_var, *,
                 stride, eps, tile_target=8192):
    N, Cin, H, W = x_nchw.shape
    Cout, _, K, _ = w_oihw.shape
    S = stride
    Ho = -(-H // S)
    Wo = -(-W // S)
    # TF-style "same" padding (extra on bottom/right), as SamePaddingConv2d does.
    pad_h = max((Ho - 1) * S + K - H, 0)
    pad_w = max((Wo - 1) * S + K - W, 0)
    ph0, pw0 = pad_h // 2, pad_w // 2
    Kc = K * K * Cin
    HW = Ho * Wo

    # ---- pixel-tile selection ---------------------------------------------
    HW128 = _round_up(HW, 128)
    tiles = max(1, -(-HW128 // tile_target))
    # v7x has 2 TensorCores: keep the total grid even so the parallel axes split.
    if (N * tiles) % 2 == 1 and HW128 >= 256:
        tiles += 1
    TM = _round_up(-(-HW128 // tiles), 128)
    HW_pad = TM * tiles

    # ---- glue: layout only (pad + im2col already in (Kc, pixels) order) ----
    x = x_nchw.astype(jnp.bfloat16)
    x = jnp.pad(x, ((0, 0), (0, 0), (ph0, pad_h - ph0), (pw0, pad_w - pw0)))
    taps = [x[:, :, kh:kh + (Ho - 1) * S + 1:S, kw:kw + (Wo - 1) * S + 1:S]
            for kh in range(K) for kw in range(K)]           # each (N, Cin, Ho, Wo)
    patches = jnp.stack(taps, axis=1).reshape(N, Kc, HW)     # lanes = output pixels
    if HW_pad != HW:
        patches = jnp.pad(patches, ((0, 0), (0, 0), (0, HW_pad - HW)))

    # Weight OIHW -> (Cout, Kc) with row order (kh, kw, cin) matching the taps,
    # with the BN scale folded in.  Shift stays f32 for the epilogue.
    inv_std = 1.0 / jnp.sqrt(run_var.astype(jnp.float32) + eps)
    scale = gamma.astype(jnp.float32) * inv_std                          # (Cout,)
    shift = (beta.astype(jnp.float32)
             - run_mean.astype(jnp.float32) * scale).reshape(Cout, 1)
    w_t = jnp.transpose(w_oihw, (0, 2, 3, 1)).reshape(Cout, Kc).astype(jnp.float32)
    w_scaled = (w_t * scale[:, None]).astype(jnp.bfloat16)               # (Cout, Kc)

    out = pl.pallas_call(
        _stem_kernel,
        out_shape=jax.ShapeDtypeStruct((N, Cout, HW_pad), jnp.bfloat16),
        grid=(N, HW_pad // TM),
        in_specs=[
            pl.BlockSpec((Cout, Kc), lambda n, i: (0, 0)),     # weight: resident
            pl.BlockSpec((Cout, 1), lambda n, i: (0, 0)),      # BN shift: resident
            pl.BlockSpec((1, Kc, TM), lambda n, i: (n, 0, i)), # pixel-tiled patches
        ],
        out_specs=pl.BlockSpec((1, Cout, TM), lambda n, i: (n, 0, i)),
        compiler_params=pltpu.CompilerParams(
            dimension_semantics=("parallel", "parallel"),      # v7x: both TCs busy
            vmem_limit_bytes=32 * 1024 * 1024),
    )(w_scaled, shift, patches)

    # Padded tail columns (HW_pad > HW) hold swish(shift) junk; slice them off.
    # Columns are (h, w) row-major per image -> reshape straight to NCHW, no transpose.
    return out[:, :, :HW].reshape(N, Cout, Ho, Wo)


def stem_reference(x_nchw, w_oihw, gamma, beta, run_mean, run_var, *, stride, eps):
    """Plain-JAX reference (lax conv + eval-mode BN + swish)."""
    N, Cin, H, W = x_nchw.shape
    K = w_oihw.shape[2]
    Ho = -(-H // stride)
    Wo = -(-W // stride)
    pad_h = max((Ho - 1) * stride + K - H, 0)
    pad_w = max((Wo - 1) * stride + K - W, 0)
    y = jax.lax.conv_general_dilated(
        x_nchw.astype(jnp.float32), w_oihw.astype(jnp.float32),
        window_strides=(stride, stride),
        padding=((pad_h // 2, pad_h - pad_h // 2),
                 (pad_w // 2, pad_w - pad_w // 2)),
        dimension_numbers=("NCHW", "OIHW", "NCHW"))
    inv = 1.0 / jnp.sqrt(run_var + eps)
    y = (y - run_mean[None, :, None, None]) * (gamma * inv)[None, :, None, None] \
        + beta[None, :, None, None]
    return y * jax.nn.sigmoid(y)


if __name__ == "__main__":
    # Module config: Stem(i_c=4, o_c=32, k_s=3, stride=2, bn_eps=1e-3, bn_mom=0.01)
    i_c, o_c, k_s, stride = 4, 32, 3, 2
    bn_eps = 1e-3
    N, H, W = 2, 16, 16

    key = jax.random.PRNGKey(0)
    kx, kw, kg, kb, km, kv = jax.random.split(key, 6)

    x = jax.random.normal(kx, (N, i_c, H, W), dtype=jnp.float32)
    # Conv weight (bias=False), OIHW as in PyTorch.
    w = jax.random.normal(kw, (o_c, i_c, k_s, k_s), dtype=jnp.float32) * \
        (1.0 / math.sqrt(i_c * k_s * k_s))
    # Round conv operands to bf16 so the kernel (bf16 MXU path) and f32 reference
    # see near-identical values; the remaining diff is the bf16 rounding of the
    # BN-scale-folded weight, the bf16 output store and the approx reciprocal.
    x = x.astype(jnp.bfloat16).astype(jnp.float32)
    w = w.astype(jnp.bfloat16).astype(jnp.float32)

    # BatchNorm parameters / running stats (eval-mode BN).
    gamma = 1.0 + 0.1 * jax.random.normal(kg, (o_c,), dtype=jnp.float32)
    beta = 0.1 * jax.random.normal(kb, (o_c,), dtype=jnp.float32)
    run_mean = 0.1 * jax.random.normal(km, (o_c,), dtype=jnp.float32)
    run_var = jnp.abs(jax.random.normal(kv, (o_c,), dtype=jnp.float32)) + 0.5

    # TODO(synk): training-mode BatchNorm (batch statistics + running-stat update)
    # is not implemented; eval-mode BN with running stats is what gets fused.

    out = stem_forward(x, w, gamma, beta, run_mean, run_var,
                       stride=stride, eps=bn_eps)
    out = jax.block_until_ready(out)

    ref = stem_reference(x, w, gamma, beta, run_mean, run_var,
                         stride=stride, eps=bn_eps)

    Ho, Wo = -(-H // stride), -(-W // stride)
    assert out.shape == (N, o_c, Ho, Wo), out.shape
    out_f32 = out.astype(jnp.float32)
    assert jnp.allclose(out_f32, ref, rtol=2e-2, atol=8e-3), \
        float(jnp.max(jnp.abs(out_f32 - ref)))

    print("KERNEL_OK")
</pallas_src>

<mosaic_0001>
module attributes {stable_mosaic.version = 11 : i64} {
  func.func @_stem_kernel(%arg0: i32, %arg1: i32, %arg2: memref<32x36xbf16, #tpu.memory_space<vmem>>, %arg3: memref<32x1xf32, #tpu.memory_space<vmem>>, %arg4: memref<1x36x128xbf16, #tpu.memory_space<vmem>>, %arg5: memref<1x32x128xbf16, #tpu.memory_space<vmem>>) attributes {dimension_semantics = [#tpu.dimension_semantics<parallel>, #tpu.dimension_semantics<parallel>], iteration_bounds = array<i64: 2, 1>, scalar_prefetch = 0 : i64, scratch_operands = 0 : i64, tpu.core_type = #tpu.core_type<tc>, window_params = [{pipeline_mode = #tpu.pipeline_mode<synchronous>, transform_indices = @transform_0, window_bounds = array<i64: 32, 36>}, {pipeline_mode = #tpu.pipeline_mode<synchronous>, transform_indices = @transform_1, window_bounds = array<i64: 32, 1>}, {transform_indices = @transform_2, window_bounds = array<i64: 1, 36, 128>}, {transform_indices = @transform_3, window_bounds = array<i64: 1, 32, 128>}]} {
    %c0 = arith.constant 0 : index
    %c0_0 = arith.constant 0 : index
    %0 = vector.load %arg2[%c0, %c0_0] : memref<32x36xbf16, #tpu.memory_space<vmem>>, vector<32x36xbf16>
    %c0_1 = arith.constant 0 : index
    %c0_2 = arith.constant 0 : index
    %c0_3 = arith.constant 0 : index
    %1 = vector.load %arg4[%c0_1, %c0_2, %c0_3] : memref<1x36x128xbf16, #tpu.memory_space<vmem>>, vector<1x36x128xbf16>
    %2 = vector.shape_cast %1 : vector<1x36x128xbf16> to vector<36x128xbf16>
    %cst = arith.constant dense<0.000000e+00> : vector<32x128xf32>
    %3 = tpu.matmul %0, %2, %cst {dimension_numbers = #tpu.dot_dimension_numbers<[1], [0], [0], [1], [0, 0, 1, 1], [], []>} : vector<32x36xbf16>, vector<36x128xbf16>, vector<32x128xf32> -> vector<32x128xf32>
    %c0_4 = arith.constant 0 : index
    %c0_5 = arith.constant 0 : index
    %4 = vector.load %arg3[%c0_4, %c0_5] : memref<32x1xf32, #tpu.memory_space<vmem>>, vector<32x1xf32>
    %5 = vector.broadcast %4 : vector<32x1xf32> to vector<32x128xf32>
    %6 = arith.addf %3, %5 : vector<32x128xf32>
    %cst_6 = arith.constant 0.000000e+00 : f32
    %7 = vector.broadcast %cst_6 : f32 to vector<32x128xf32>
    %8 = arith.subf %7, %6 : vector<32x128xf32>
    %9 = math.exp %8 : vector<32x128xf32>
    %cst_7 = arith.constant 1.000000e+00 : f32
    %10 = vector.broadcast %cst_7 : f32 to vector<32x128xf32>
    %11 = arith.addf %10, %9 : vector<32x128xf32>
    %12 = tpu.reciprocal %11 {approx = true} : vector<32x128xf32> -> vector<32x128xf32>
    %13 = arith.mulf %6, %12 : vector<32x128xf32>
    %14 = arith.truncf %13 : vector<32x128xf32> to vector<32x128xbf16>
    %c0_8 = arith.constant 0 : index
    %c0_9 = arith.constant 0 : index
    %c0_10 = arith.constant 0 : index
    %15 = vector.load %arg5[%c0_8, %c0_9, %c0_10] : memref<1x32x128xbf16, #tpu.memory_space<vmem>>, vector<1x32x128xbf16>
    %16 = vector.shape_cast %15 : vector<1x32x128xbf16> to vector<32x128xbf16>
    %17 = vector.shape_cast %14 : vector<32x128xbf16> to vector<1x32x128xbf16>
    tpu.vector_store %arg5[%c0_8, %c0_9, %c0_10], %17 {strides = array<i32>} : memref<1x32x128xbf16, #tpu.memory_space<vmem>>, vector<1x32x128xbf16>,
    return
  }
  func.func @transform_0(%arg0: i32, %arg1: i32) -> (i32, i32) {
    %c0_i32 = arith.constant 0 : i32
    %c0_i32_0 = arith.constant 0 : i32
    %c0_i32_1 = arith.constant 0 : i32
    return %c0_i32, %c0_i32_0 : i32, i32
  }
  func.func @transform_1(%arg0: i32, %arg1: i32) -> (i32, i32) {
    %c0_i32 = arith.constant 0 : i32
    %c0_i32_0 = arith.constant 0 : i32
    %c0_i32_1 = arith.constant 0 : i32
    return %c0_i32, %c0_i32_0 : i32, i32
  }
  func.func @transform_2(%arg0: i32, %arg1: i32) -> (i32, i32, i32) {
    %c0_i32 = arith.constant 0 : i32
    %c0_i32_0 = arith.constant 0 : i32
    return %arg0, %c0_i32, %arg1 : i32, i32, i32
  }
  func.func @transform_3(%arg0: i32, %arg1: i32) -> (i32, i32, i32) {
    %c0_i32 = arith.constant 0 : i32
    %c0_i32_0 = arith.constant 0 : i32
    return %arg0, %c0_i32, %arg1 : i32, i32, i32
  }
}

</mosaic_0001>

<bundles_post_ra>
// kernel: tpu_custom_call.1
= control target key start
LH: loop header
LB: loop body
LE: loop exit
PB: predicated region body
PF: predicated region fallthrough
CT: control target
= control target key end

     0   :  { %8 = vsyncpa [#allocation3], 0  ;;  %s826_s0 = inlined_call_operand.vmem [shape: bf16[32,36], index: 0, kind: input, shape index: {}]   ;;  %s827_s1 = inlined_call_operand.vmem [shape: f32[32,1], index: 1, kind: input, shape index: {}]   ;;  %s828_s2 = inlined_call_operand.vmem [shape: bf16[2,36,128], index: 2, kind: input, shape index: {}]   ;;  %s829_s3 = inlined_call_operand.hbm [shape: bf16[2,32,128], index: 3, kind: output, shape index: {}]  }
   0x1   :  { %10 = vsyncpa [#allocation3 + $0x1], 0  ;;  %s691_s12 = smov 0   ;;  %s693_s13 = smov 0  }
   0x2   :  { %s695_s14 = smov 0   ;;  %s697_s15 = smov 0  }
   0x3   :  { %s699_s16 = smov 0   ;;  %s701_s17 = smov 0  }
   0x4 LB: > { %s450_s18 = sadd.s32 4294967295, %s665_s17   ;;  %s451_s19 = sadd.s32 4294967294, %s665_s17   ;;  %s665_s17 = sphi %s701_s17, %s16_s17   ;;  %s661_s16 = sphi %s699_s16, %s836_s16   ;;  %s657_s15 = sphi %s697_s15, %s835_s15   ;;  %s653_s14 = sphi %s695_s14, %s834_s14   ;;  %s649_s13 = sphi %s693_s13, %s833_s13   ;;  %s645_s12 = sphi %s691_s12, %s832_s12  }
   0x5   : > { %s28_s20 = sadd.s32 1, %s661_s16  ;;  %s107_s21 = sadd.s32 1, %s653_s14 }
   0x6   : > { %p30_p0 = scmp.ge.s32.totalorder %s28_s20, 2  ;;  %p117_p1 = scmp.ne.s32.totalorder %s653_s14, %s649_s13 }
   0x7   : > { %p118_p2 = scmp.eq.s32.totalorder %s450_s18, 1  ;;  %p123_p3 = scmp.ne.s32.totalorder %s649_s13, %s645_s12 }
   0x8   : > { %s838_s20 = smov (%p30_p0, %s28_s20), 0  ;;  %p124_p5 = scmp.eq.s32.totalorder %s451_s19, 1 }
   0x9   : > { %p731_p4 = por %p118_p2, %p117_p1  ;;  %s102_s23 = ssub.s32 %s661_s16, %s838_s20 }
   0xa   : > { %p454_p6 = scmp.ge.s32.totalorder %s665_s17, 1  ;;  %p105_p7 = scmp.eq.s32.totalorder %s102_s23, 0 }
   0xb   : > { %p738_p8 = por %p124_p5, %p123_p3  ;;  %p159_p9 = scmp.lt.s32.totalorder %s665_s17, 3 }
   0xc   : > { %s744_s25 = scalar_select %p105_p7, %s653_s14, %s107_s21  }
   0xd   : > { %p160_p10 = pnand %p454_p6, %p159_p9 }
   0xe   : > { %p186_p11 = scmp.lt.s32.totalorder (!%p160_p10), %s657_s15, 1  ;;  %v569_v0 = vld [vmem:[%s826_s0] sm:$0xff] (!%p160_p10)   ;;  %vm253_vm0 = vcmask (!%p160_p10), 293888   ;;  %v206_v1 = vld [vmem:[%s827_s1 + $0x10] sm:$0xff] (!%p160_p10)  ;;  %v667_v3 = vmov (!%p160_p10), 0   ;;  %v207_v4 = vld [vmem:[%s827_s1 + $0x18] sm:$0xff] (!%p160_p10) }
   0xf   : > { %163 = sbr.rel (%p160_p10) target bundleno = 304 (0x130), region = 32  ;;  %v204_v2 = vld [vmem:[%s827_s1] sm:$0xff] (!%p160_p10)  ;;  %500 = vmatprep.mubr.msk.bf16.mxu0 (!%p160_p10), %vm253_vm0, %v569_v0  ;;  %565 = vset.pattern.permute.xlu1 (!%p160_p10), %v667_v3  ;;  %v205_v5 = vld [vmem:[%s827_s1 + $0x8] sm:$0xff] (!%p160_p10)  ;;  %vm260_vm1 = vcmask (!%p160_p10), 1041408   ;;  %s183_s26 = sand.u32 (!%p160_p10), 1, %s649_s13  }
  0x10   : > { %564 = vset.pattern.permute.xlu0 (!%p160_p10), %v667_v3  ;;  %220 = vperm.xlu1 (!%p160_p10), %565, %v206_v1   ;;  %v570_v10 = vld [vmem:[%s826_s0 + $0x8] sm:$0xff] (!%p160_p10)   ;;  %s455_s27 = sshll.u32 (!%p160_p10), %s183_s26, 4  ;;  %s477_s30 = sshll.u32 (!%p160_p10), %s657_s15, 8 }
  0x11   : > { %210 = vperm.xlu0 (!%p160_p10), %564, %v204_v2   ;;  %s668_s8 = smov (!%p160_p10), [#allocation2]  }
  0x12   : > { %s591_s9 = sshll.u32 (!%p160_p10), %s668_s8, 4  ;;  %s592_s9 = int_to_ptr.vmem [resolvable:$false] %s591_s9 }
  0x13   : > { %s593_s10 = scalar_lea.vmem (!%p160_p10), %s592_s9, 512 }
  0x14   : > { %225 = vperm.xlu1 (!%p160_p10), %565, %v207_v4  }
  0x15   : > { %215 = vperm.xlu0 (!%p160_p10), %564, %v205_v5  }
  0x16   : > { %s187_s28 = scalar_select %p186_p11, %s657_s15, 1 }
  0x17   : > { %s780_s15 = scalar_lea.sflag [#allocation3], %s183_s26 }
  0x18   : > { %s505_s6 = smul.u32 20, %s187_s28  ;;  %s185_s28 = scalar_lea.vmem [#allocation2], %s455_s27 }
  0x19   : > { %s372_s29 = sshll.u32 %s185_s28, 4  ;;  %s773_s29 = int_to_ptr.vmem [resolvable:$true] %s372_s29 }
  0x1a   : > { %s193_s11 = scalar_lea.vmem %s828_s2, %s505_s6  ;;  %s778_s6 = scalar_lea.hbm %s829_s3, %s477_s30 }
  0x1b   : > { %v566_v6 = vld [vmem:[%s193_s11] sm:$0xff]   ;;  %v567_v7 = vld [vmem:[%s193_s11 + $0x8] sm:$0xff]   ;;  %v568_v8 = vld [vmem:[%s193_s11 + $0x10] ss:$0 sps:$4 sm:$0x33]   ;;  %s587_s7 = scalar_lea.vmem %s773_s29, 256  ;;  %p594_p1 = scmp.lt.s32.totalorder %s773_s29, %s592_s9 }
  0x1c   : > { %494 = vmatprep.subr.bf16.mxu0 %v566_v6  ;;  %v262_v9 = vsel %vm260_vm1, %v568_v8, 0  ;;  %p588_p12 = scmp.ne.s32.totalorder %s773_s29, %s587_s7  ;;  %p595_p2 = scmp.lt.s32.totalorder %s593_s10, %s587_s7 }
  0x1d   : > { %495 = vmatpush3.bf16.msra.mxu0 %v566_v6 }
  0x1e   : > { %496 = vmatprep.subr.bf16.mxu0 %v567_v7  ;;  %p589_p13 = pnand %p588_p12, %p731_p4  ;;  %p596_p3 = por %p595_p2, %p594_p1 }
  0x20   : > { %p590_p0 = pneg %p589_p13 }
  0x21   : > { %497 = vmatpush3.bf16.msra.mxu0 %v567_v7 }
  0x22   : > { %504 = vmatprep.subr.msk.bf16.mxu0 %vm260_vm1, %v568_v8  ;;  %p597_p5 = pnand %p596_p3, %p590_p0 }
  0x25   : > { %499 = vmatpush3.bf16.msra.mxu0 %v262_v9 }
  0x28   : > { %501 = vmatmul.mubr.msk.bf16.vlgmr.msra.gmra.mrb[0].mxu0 %vm253_vm0, %v570_v10 }
  0x8f   : > { %v221_v11 = vpop.permute.xlu1 %220 }
  0x90   : > { %v211_v12 = vpop.permute.xlu0 %210 }
  0x93   : > { %v226_v16 = vpop.permute.xlu1 %225 }
  0x94   : > { %v216_v19 = vpop.permute.xlu0 %215 }
  0xfb   : > { %v502_v13 = vpop.f32.mrb[0].mxu0 }
  0xfc   : > { %v307_v14 = vadd.f32 %v502_v13, %v221_v11  ;;  %v298_v15 = vpop.f32.mrb[1].mxu0 }
  0xfd   : > { %v299_v17 = vadd.f32 %v298_v15, %v211_v12  ;;  %v503_v18 = vpop.f32.mrb[2].mxu0 }
  0xfe   : > { %v315_v20 = vsub.f32 0.0, %v307_v14  ;;  %v310_v21 = vadd.f32 %v503_v18, %v226_v16  ;;  %v301_v22 = vpop.f32.mrb[3].mxu0 }
  0xff   : > { %v313_v23 = vsub.f32 0.0, %v299_v17  ;;  %v302_v24 = vadd.f32 %v301_v22, %v216_v19 }
 0x100   : > { %v321_v25 = vmul.f32 1.442695, %v315_v20  ;;  %v316_v26 = vsub.f32 0.0, %v310_v21 }
 0x101   : > { %v317_v27 = vmul.f32 1.442695, %v313_v23  ;;  %v314_v28 = vsub.f32 0.0, %v302_v24 }
 0x102   : > { %571 = vpow2.f32 %v321_v25  ;;  %v323_v29 = vmul.f32 1.442695, %v316_v26 }
 0x103   : > { %573 = vpow2.f32 %v317_v27  ;;  %v319_v30 = vmul.f32 1.442695, %v314_v28 }
 0x104   : > { %575 = vpow2.f32 %v323_v29 }
 0x105   : > { %577 = vpow2.f32 %v319_v30 }
 0x10c   : > { %v572_v31 = vpop.eup %571 }
 0x10d   : > { %v574_v32 = vpop.eup %573  ;;  %v327_v33 = vadd.f32 1.0, %v572_v31 }
 0x10e   : > { %v576_v34 = vpop.eup %575  ;;  %v325_v35 = vadd.f32 1.0, %v574_v32 }
 0x10f   : > { %v578_v36 = vpop.eup %577  ;;  %579 = vrcp.f32 %v327_v33  ;;  %v328_v37 = vadd.f32 1.0, %v576_v34 }
 0x110   : > { %581 = vrcp.f32 %v325_v35  ;;  %v326_v38 = vadd.f32 1.0, %v578_v36 }
 0x111   : > { %583 = vrcp.f32 %v328_v37 }
 0x112   : > { %585 = vrcp.f32 %v326_v38 }
 0x119   : > { %v580_v39 = vpop.eup %579 }
 0x11a   : > { %v582_v40 = vpop.eup %581  ;;  %v335_v43 = vmul.f32 %v580_v39, %v307_v14 }
 0x11b   : > { %v584_v41 = vpop.eup %583  ;;  %v333_v45 = vmul.f32 %v582_v40, %v299_v17 }
 0x11c   : > { %v586_v42 = vpop.eup %585  ;;  %v336_v44 = vmul.f32 %v584_v41, %v310_v21 }
 0x11d   : > { %v334_v46 = vmul.f32 %v586_v42, %v302_v24 }
 0x11e   : > { %v486_v47 = vpack.c.bf16 %v336_v44, %v335_v43 }
 0x11f   : > { %v481_v48 = vpack.c.bf16 %v334_v46, %v333_v45 }
 0x120   : > { %488 = vst [vmem:[%s185_s28 + $0x8] sm:$0xff] %v486_v47  }
 0x121   : > { %482 = vst [vmem:[%s185_s28] sm:$0xff] %v481_v48  }
 0x122   : > { %600 = shalt.err (!%p597_p5)
}
 0x123   : > { %s601_s11 = scalar_lea.hbm %s778_s6, 256  ;;  %s605_s21 = scalar_lea.hbm %s829_s3, 512 }
 0x124   : > { %p602_p6 = scmp.ne.s32.totalorder %s778_s6, %s601_s11  ;;  %p606_p10 = scmp.lt.u32.totalorder %s778_s6, %s829_s3 }
 0x125   : > { %p607_p11 = scmp.lt.u32.totalorder %s605_s21, %s601_s11  ;;  %p609_p13 = scmp.lt.u32.totalorder %s601_s11, %s778_s6 }
 0x126   : > { %p603_p7 = pnand %p602_p6, %p731_p4 }
 0x127   : > { %p608_p12 = por %p607_p11, %p606_p10 }
 0x128   : > { %p604_p9 = pneg %p603_p7 }
 0x129   : > { %p610_p0 = por %p609_p13, %p608_p12 }
 0x12b   : > { %p611_p1 = pnand %p610_p0, %p604_p9 }
 0x12d   : > { %614 = shalt.err (!%p611_p1)
}
 0x12e   : > { %s669_s27 = smov 64   ;;  %s670_s28 = smov 4  }
 0x12f   : > { %506 = dma.vmem_to_hbm [thread:$0]  (%p731_p4), %s773_s29, 256, %s778_s6, %s780_s15, %s669_s27, %s669_s27, %s670_s28  }
 0x130 PF: > { %p512_p2 = scmp.ge.s32.totalorder %s665_s17, 2  ;;  %s387_s30 = sand.u32 1, %s645_s12  }
 0x131   : > { %s388_s4 = scalar_lea.sflag [#allocation3], %s387_s30 }
 0x132   : > { %p509_p3 = pnand %p512_p2, %p738_p8 }
 0x134   : > { %640 = dma.done.wait (!%p509_p3), %s388_s4, 256  }
 0x135   : > { %642 = vsyncadd (!%p509_p3), %s388_s4, 4294967040  ;;  %s16_s17 = sadd.s32 1, %s665_s17   ;;  %s832_s12 = smov %s649_s13 }
 0x136   : > { %p13_p5 = scmp.ge.s32.totalorder %s16_s17, 4   ;;  %s833_s13 = smov %s653_s14 }
 0x137   : > { %s834_s14 = smov %s744_s25  ;;  %s835_s15 = smov %s661_s16 }
 0x138   : > { %s836_s16 = smov %s838_s20  ;;  %15 = sbr.rel (!%p13_p5) target bundleno = 4 (0x4), region = 67 }
 0x13f   :  { %393 = vsyncpa [#allocation3], 1 }
 0x140   :  { %395 = vsyncpa [#allocation3 + $0x1], 1 }

</bundles_post_ra>
